<compile_context>
chip_gen: v7x
topology: tpu7x:2x2x1
jax: 0.10.0
libtpu: 0.0.40
codegen_flags: <defaults>
</compile_context>

<pallas_src>
import functools

import jax
import jax.numpy as jnp
from jax.experimental import pallas as pl
from jax.experimental.pallas import tpu as pltpu


# ----------------------------------------------------------------------------
# Kernel
# ----------------------------------------------------------------------------
def a2c_kernel(x_ref, w1_ref, b1_ref, w2_ref, b2_ref, out_ref, *, num_outputs):
    x = x_ref[...]                                                  # (tb, D) bf16

    # Fused layer 1 (actor hidden | critic hidden) + ReLU.  bf16 in, f32 acc.
    h = jnp.dot(x, w1_ref[...], preferred_element_type=jnp.float32)
    h = jnp.maximum(h + b1_ref[...], 0.0)                           # (tb, 256) f32

    # Fused, lane-padded, block-diagonal layer 2: lanes 0..A-1 actor logits,
    # lane A critic value, remaining lanes zero-weight padding.
    y = jnp.dot(h.astype(w2_ref.dtype), w2_ref[...],
                preferred_element_type=jnp.float32) + b2_ref[...]   # (tb, 128) f32

    lane = jax.lax.broadcasted_iota(jnp.int32, y.shape, 1)
    is_policy = lane < num_outputs

    # Masked, numerically stable softmax over policy lanes, all in f32.
    masked = jnp.where(is_policy, y, -jnp.inf)
    m = jnp.max(masked, axis=-1, keepdims=True)
    e = jnp.exp(masked - m)                    # masked lanes -> exp(-inf) = 0
    denom = jnp.sum(e, axis=-1, keepdims=True)
    probs = e / denom                          # EXACT normalization (sum == 1)

    # Single lane-dense store: policy lanes, value at lane A, zeros after.
    out_ref[...] = jnp.where(lane == num_outputs, y, probs).astype(out_ref.dtype)


# ----------------------------------------------------------------------------
# Parameter fusion (done ONCE, not per call)
# ----------------------------------------------------------------------------
def fuse_params(p, num_outputs, compute_dtype=jnp.bfloat16):
    """Fuse actor/critic layer-1 and build the block-diagonal padded layer-2."""
    A = num_outputs
    H = p["w1a"].shape[1]                                 # 128
    out_pad = pl.cdiv(A + 1, 128) * 128                   # lane-dense width

    w1 = jnp.concatenate([p["w1a"], p["w1c"]], axis=1).astype(compute_dtype)
    b1 = jnp.concatenate([p["b1a"], p["b1c"]], axis=1).astype(jnp.float32)

    w2 = jnp.zeros((2 * H, out_pad), jnp.float32)
    w2 = w2.at[:H, :A].set(p["w2a"])                      # actor block
    w2 = w2.at[H:, A:A + 1].set(p["w2c"])                 # critic block
    w2 = w2.astype(compute_dtype)

    b2 = jnp.zeros((1, out_pad), jnp.float32)
    b2 = b2.at[:, :A].set(p["b2a"])
    b2 = b2.at[:, A:A + 1].set(p["b2c"])

    return dict(w1=w1, b1=b1, w2=w2, b2=b2,
                num_outputs=A, compute_dtype=compute_dtype)


# ----------------------------------------------------------------------------
# Wrapper
# ----------------------------------------------------------------------------
def _round_up(n, m):
    return ((n + m - 1) // m) * m


def _choose_tile_b(B, max_tile=1024):
    """Batch tile: >=2 programs when splittable (v7x megacore), 8-aligned,
    prefers tiles dividing B, grows large to amortize per-step overhead."""
    if B <= 8:
        return B                               # full-dim block is always legal
    tile = min(_round_up(pl.cdiv(B, 2), 8), max_tile)
    for cand in (1024, 512, 256, 128, 64, 32, 16, 8):
        if cand <= tile and B % cand == 0:     # avoid ragged last block
            return cand
    return tile


def _resident_spec(shape, single_buffer):
    """BlockSpec for an operand that stays resident across the whole grid."""
    kwargs = {}
    if single_buffer and hasattr(pl, "Buffered"):
        # Resident weights don't need double buffers; only matters when the
        # weights are large enough to eat into VMEM (big num_inputs).
        kwargs["pipeline_mode"] = pl.Buffered(1)
    return pl.BlockSpec(shape, lambda i: (0, 0), **kwargs)


def actor2critic_forward(x, fused, out_dtype=jnp.bfloat16):
    """x: (B, num_inputs) f32. fused: output of fuse_params. Returns f32."""
    B, D = x.shape
    A = fused["num_outputs"]
    H2 = fused["w1"].shape[1]              # 256
    out_pad = fused["w2"].shape[1]         # 128 for A <= 127
    compute_dtype = fused["compute_dtype"]

    tile_b = _choose_tile_b(B)
    grid = (pl.cdiv(B, tile_b),)

    in_item = jnp.dtype(compute_dtype).itemsize
    out_item = jnp.dtype(out_dtype).itemsize

    resident_w_bytes = ((D * H2 + H2 * out_pad) * in_item
                        + (H2 + out_pad) * 4)
    act_bytes = tile_b * D * in_item + tile_b * out_pad * out_item
    est_vmem = 2 * act_bytes + 2 * resident_w_bytes
    single_buffer_weights = resident_w_bytes > (4 << 20)

    cp_kwargs = dict(dimension_semantics=("parallel",))
    if est_vmem > (16 << 20):
        cp_kwargs["vmem_limit_bytes"] = min(int(est_vmem * 2), 64 << 20)

    kernel = functools.partial(a2c_kernel, num_outputs=A)

    cost = pl.CostEstimate(
        flops=2 * B * (D * H2 + H2 * out_pad),
        transcendentals=B * out_pad,
        bytes_accessed=(B * D * in_item + resident_w_bytes
                        + B * out_pad * out_item),
    )

    out = pl.pallas_call(
        kernel,
        out_shape=jax.ShapeDtypeStruct((B, out_pad), out_dtype),
        grid=grid,
        in_specs=[
            pl.BlockSpec((tile_b, D), lambda i: (i, 0)),      # activations: batch-tiled
            _resident_spec((D, H2), single_buffer_weights),   # fused W1
            _resident_spec((1, H2), single_buffer_weights),   # fused b1
            _resident_spec((H2, out_pad), single_buffer_weights),  # fused W2
            _resident_spec((1, out_pad), single_buffer_weights),   # fused b2
        ],
        out_specs=pl.BlockSpec((tile_b, out_pad), lambda i: (i, 0)),
        compiler_params=pltpu.CompilerParams(**cp_kwargs),
        cost_estimate=cost,
    )(x.astype(compute_dtype), fused["w1"], fused["b1"], fused["w2"], fused["b2"])

    policy = out[:, :A].astype(jnp.float32)
    value = out[:, A:A + 1].astype(jnp.float32)
    return policy, value


# ----------------------------------------------------------------------------
# Init + pure-JAX reference (matches PyTorch Actor2Critic.forward)
# ----------------------------------------------------------------------------
def init_params(key, num_inputs, num_outputs, hidden=128):
    ks = jax.random.split(key, 8)

    def lin(kw, kb, fan_in, fan_out):
        bound = 1.0 / jnp.sqrt(jnp.float32(fan_in))
        w = jax.random.uniform(kw, (fan_in, fan_out), jnp.float32, -bound, bound)
        b = jax.random.uniform(kb, (1, fan_out), jnp.float32, -bound, bound)
        return w, b

    w1a, b1a = lin(ks[0], ks[1], num_inputs, hidden)
    w2a, b2a = lin(ks[2], ks[3], hidden, num_outputs)
    w1c, b1c = lin(ks[4], ks[5], num_inputs, hidden)
    w2c, b2c = lin(ks[6], ks[7], hidden, 1)
    return dict(w1a=w1a, b1a=b1a, w2a=w2a, b2a=b2a,
                w1c=w1c, b1c=b1c, w2c=w2c, b2c=b2c)


def reference_forward(x, p):
    h_a = jnp.maximum(x @ p["w1a"] + p["b1a"], 0.0)
    policy = jax.nn.softmax(h_a @ p["w2a"] + p["b2a"], axis=-1)
    h_c = jnp.maximum(x @ p["w1c"] + p["b1c"], 0.0)
    value = h_c @ p["w2c"] + p["b2c"]
    return policy, value


if __name__ == "__main__":
    key = jax.random.PRNGKey(0)
    k_x, k_p = jax.random.split(key)

    batch = 16            # small, but >8 so the batch grid has 2 programs
    num_inputs = 32
    num_outputs = 8

    x = jax.random.normal(k_x, (batch, num_inputs), dtype=jnp.float32)
    params = init_params(k_p, num_inputs, num_outputs)
    fused = fuse_params(params, num_outputs)       # fused + bf16-cast once

    policy, value = actor2critic_forward(x, fused)
    jax.block_until_ready((policy, value))

    ref_policy, ref_value = reference_forward(x, params)
    assert policy.shape == (batch, num_outputs)
    assert value.shape == (batch, 1)
    # Tolerances account for bf16 MXU operands and the bf16 output slab
    # (f32 accumulation and f32 softmax inside the kernel).
    assert jnp.allclose(policy, ref_policy, atol=2e-2, rtol=2e-2)
    assert jnp.allclose(value, ref_value, atol=3e-2, rtol=3e-2)
    # In-kernel normalization is exact; residual is bf16 output quantization
    # of the 8 stored probabilities (worst case ~2e-3).
    assert jnp.allclose(jnp.sum(policy, axis=-1), 1.0, atol=5e-3)

    print("KERNEL_OK")
</pallas_src>

<mosaic_0001>
module attributes {stable_mosaic.version = 11 : i64} {
  func.func @a2c_kernel(%arg0: i32, %arg1: memref<8x32xbf16, #tpu.memory_space<vmem>>, %arg2: memref<32x256xbf16, #tpu.memory_space<vmem>>, %arg3: memref<1x256xf32, #tpu.memory_space<vmem>>, %arg4: memref<256x128xbf16, #tpu.memory_space<vmem>>, %arg5: memref<1x128xf32, #tpu.memory_space<vmem>>, %arg6: memref<8x128xbf16, #tpu.memory_space<vmem>>) attributes {dimension_semantics = [#tpu.dimension_semantics<parallel>], iteration_bounds = array<i64: 2>, scalar_prefetch = 0 : i64, scratch_operands = 0 : i64, tpu.core_type = #tpu.core_type<tc>, window_params = [{transform_indices = @transform_0, window_bounds = array<i64: 8, 32>}, {pipeline_mode = #tpu.pipeline_mode<synchronous>, transform_indices = @transform_1, window_bounds = array<i64: 32, 256>}, {pipeline_mode = #tpu.pipeline_mode<synchronous>, transform_indices = @transform_2, window_bounds = array<i64: 1, 256>}, {pipeline_mode = #tpu.pipeline_mode<synchronous>, transform_indices = @transform_3, window_bounds = array<i64: 256, 128>}, {pipeline_mode = #tpu.pipeline_mode<synchronous>, transform_indices = @transform_4, window_bounds = array<i64: 1, 128>}, {transform_indices = @transform_5, window_bounds = array<i64: 8, 128>}]} {
    %c0 = arith.constant 0 : index
    %c0_0 = arith.constant 0 : index
    %0 = vector.load %arg1[%c0, %c0_0] : memref<8x32xbf16, #tpu.memory_space<vmem>>, vector<8x32xbf16>
    %c0_1 = arith.constant 0 : index
    %c0_2 = arith.constant 0 : index
    %1 = vector.load %arg2[%c0_1, %c0_2] : memref<32x256xbf16, #tpu.memory_space<vmem>>, vector<32x256xbf16>
    %cst = arith.constant dense<0.000000e+00> : vector<8x256xf32>
    %2 = tpu.matmul %0, %1, %cst {dimension_numbers = #tpu.dot_dimension_numbers<[1], [0], [0], [1], [0, 0, 1, 1], [], []>} : vector<8x32xbf16>, vector<32x256xbf16>, vector<8x256xf32> -> vector<8x256xf32>
    %c0_3 = arith.constant 0 : index
    %c0_4 = arith.constant 0 : index
    %3 = vector.load %arg3[%c0_3, %c0_4] : memref<1x256xf32, #tpu.memory_space<vmem>>, vector<1x256xf32>
    %4 = vector.broadcast %3 : vector<1x256xf32> to vector<8x256xf32>
    %5 = arith.addf %2, %4 : vector<8x256xf32>
    %cst_5 = arith.constant 0.000000e+00 : f32
    %6 = vector.broadcast %cst_5 : f32 to vector<8x256xf32>
    %7 = arith.maximumf %5, %6 : vector<8x256xf32>
    %8 = arith.truncf %7 : vector<8x256xf32> to vector<8x256xbf16>
    %c0_6 = arith.constant 0 : index
    %c0_7 = arith.constant 0 : index
    %9 = vector.load %arg4[%c0_6, %c0_7] : memref<256x128xbf16, #tpu.memory_space<vmem>>, vector<256x128xbf16>
    %cst_8 = arith.constant dense<0.000000e+00> : vector<8x128xf32>
    %10 = tpu.matmul %8, %9, %cst_8 {dimension_numbers = #tpu.dot_dimension_numbers<[1], [0], [0], [1], [0, 0, 1, 1], [], []>} : vector<8x256xbf16>, vector<256x128xbf16>, vector<8x128xf32> -> vector<8x128xf32>
    %c0_9 = arith.constant 0 : index
    %c0_10 = arith.constant 0 : index
    %11 = vector.load %arg5[%c0_9, %c0_10] : memref<1x128xf32, #tpu.memory_space<vmem>>, vector<1x128xf32>
    %12 = vector.broadcast %11 : vector<1x128xf32> to vector<8x128xf32>
    %13 = arith.addf %10, %12 : vector<8x128xf32>
    %14 = tpu.iota {dimensions = array<i32: 1>} : vector<8x128xi32>
    %c8_i32 = arith.constant 8 : i32
    %15 = vector.broadcast %c8_i32 : i32 to vector<8x128xi32>
    %16 = arith.cmpi slt, %14, %15 : vector<8x128xi32>
    %cst_11 = arith.constant 0xFF800000 : f32
    %17 = vector.broadcast %cst_11 : f32 to vector<8x128xf32>
    %18 = arith.select %16, %13, %17 : vector<8x128xi1>, vector<8x128xf32>
    %cst_12 = arith.constant dense<0xFF800000> : vector<8xf32>
    %19 = vector.multi_reduction <maximumf>, %18, %cst_12 [1] : vector<8x128xf32> to vector<8xf32>
    %20 = vector.shape_cast %19 : vector<8xf32> to vector<8x1xf32>
    %21 = vector.broadcast %20 : vector<8x1xf32> to vector<8x128xf32>
    %22 = arith.subf %18, %21 : vector<8x128xf32>
    %23 = math.exp %22 : vector<8x128xf32>
    %cst_13 = arith.constant dense<0.000000e+00> : vector<8xf32>
    %24 = vector.multi_reduction <add>, %23, %cst_13 [1] : vector<8x128xf32> to vector<8xf32>
    %25 = vector.shape_cast %24 : vector<8xf32> to vector<8x1xf32>
    %26 = vector.broadcast %25 : vector<8x1xf32> to vector<8x128xf32>
    %27 = arith.divf %23, %26 : vector<8x128xf32>
    %c8_i32_14 = arith.constant 8 : i32
    %28 = vector.broadcast %c8_i32_14 : i32 to vector<8x128xi32>
    %29 = arith.cmpi eq, %14, %28 : vector<8x128xi32>
    %30 = arith.select %29, %13, %27 : vector<8x128xi1>, vector<8x128xf32>
    %31 = arith.truncf %30 : vector<8x128xf32> to vector<8x128xbf16>
    %c0_15 = arith.constant 0 : index
    %c0_16 = arith.constant 0 : index
    %32 = vector.load %arg6[%c0_15, %c0_16] : memref<8x128xbf16, #tpu.memory_space<vmem>>, vector<8x128xbf16>
    tpu.vector_store %arg6[%c0_15, %c0_16], %31 {strides = array<i32>} : memref<8x128xbf16, #tpu.memory_space<vmem>>, vector<8x128xbf16>,
    return
  }
  func.func @transform_0(%arg0: i32) -> (i32, i32) {
    %c0_i32 = arith.constant 0 : i32
    %c0_i32_0 = arith.constant 0 : i32
    return %arg0, %c0_i32 : i32, i32
  }
  func.func @transform_1(%arg0: i32) -> (i32, i32) {
    %c0_i32 = arith.constant 0 : i32
    %c0_i32_0 = arith.constant 0 : i32
    %c0_i32_1 = arith.constant 0 : i32
    return %c0_i32, %c0_i32_0 : i32, i32
  }
  func.func @transform_2(%arg0: i32) -> (i32, i32) {
    %c0_i32 = arith.constant 0 : i32
    %c0_i32_0 = arith.constant 0 : i32
    %c0_i32_1 = arith.constant 0 : i32
    return %c0_i32, %c0_i32_0 : i32, i32
  }
  func.func @transform_3(%arg0: i32) -> (i32, i32) {
    %c0_i32 = arith.constant 0 : i32
    %c0_i32_0 = arith.constant 0 : i32
    %c0_i32_1 = arith.constant 0 : i32
    return %c0_i32, %c0_i32_0 : i32, i32
  }
  func.func @transform_4(%arg0: i32) -> (i32, i32) {
    %c0_i32 = arith.constant 0 : i32
    %c0_i32_0 = arith.constant 0 : i32
    %c0_i32_1 = arith.constant 0 : i32
    return %c0_i32, %c0_i32_0 : i32, i32
  }
  func.func @transform_5(%arg0: i32) -> (i32, i32) {
    %c0_i32 = arith.constant 0 : i32
    %c0_i32_0 = arith.constant 0 : i32
    return %arg0, %c0_i32 : i32, i32
  }
}

</mosaic_0001>

<bundles_post_ra>
// kernel: tpu_custom_call.1
= control target key start
LH: loop header
LB: loop body
LE: loop exit
PB: predicated region body
PF: predicated region fallthrough
CT: control target
= control target key end

     0   :  { %10 = vsyncpa [#allocation3], 0  ;;  %s1245_s0 = inlined_call_operand.hbm [shape: bf16[16,32], index: 0, kind: input, shape index: {}]   ;;  %s1246_s1 = inlined_call_operand.hbm [shape: bf16[32,256], index: 1, kind: input, shape index: {}]   ;;  %s1247_s2 = inlined_call_operand.vmem [shape: f32[1,256], index: 2, kind: input, shape index: {}]   ;;  %s1248_s3 = inlined_call_operand.hbm [shape: bf16[256,128], index: 3, kind: input, shape index: {}]   ;;  %s1249_s4 = inlined_call_operand.vmem [shape: f32[1,128], index: 4, kind: input, shape index: {}]   ;;  %s1250_s5 = inlined_call_operand.hbm [shape: bf16[16,128], index: 5, kind: output, shape index: {}]  }
   0x1   :  { %12 = vsyncpa [#allocation3 + $0x1], 0 }
   0x2   :  { %13 = vsyncpa [#allocation6], 0 }
   0x3   :  { %14 = vsyncpa [#allocation4], 0 }
   0x4   :  { %16 = vsyncpa [#allocation4 + $0x1], 0  ;;  %s1006_s18 = smov 0   ;;  %s1008_s19 = smov 0  }
   0x5   :  { %s1010_s20 = smov 0   ;;  %s1012_s21 = smov 0  }
   0x6 LB: > { %s1027_s22 = sadd.s32 4294967295, %s965_s21   ;;  %s651_s23 = sadd.s32 4294967294, %s965_s21   ;;  %s965_s21 = sphi %s1012_s21, %s1270_s21   ;;  %s961_s20 = sphi %s1010_s20, %s1269_s20   ;;  %s957_s19 = sphi %s1008_s19, %s1268_s19   ;;  %s953_s18 = sphi %s1006_s18, %s1267_s18  }
   0x7   : > { %p42_p0 = scmp.ne.s32.totalorder %s957_s19, %s953_s18  ;;  %p1251_p1 = scmp.eq.s32.totalorder %s1027_s22, 0 }
   0x8   : > { %p156_p3 = scmp.eq.s32.totalorder %s651_s23, 1  ;;  %p652_p5 = scmp.ge.s32.totalorder %s965_s21, 1 }
   0x9   : > { %p1036_p4 = por %p1251_p1, %p42_p0  ;;  %p163_p7 = scmp.lt.s32.totalorder %s965_s21, 3 }
   0xa   : > { %p1041_p6 = por %p156_p3, %p42_p0  ;;  %s967_s27 = smov [#allocation5]  }
   0xb   : > { %s1254_s24 = scalar_select %p1036_p4, 1, 0 }
   0xc   : > { %s1255_s25 = scalar_select %p1041_p6, 1, 0 }
   0xd   : > { %p1046_p8 = pnand %p652_p5, %p163_p7  ;;  %s175_s28 = sshll.u32 %s967_s27, 4  ;;  %s1050_s28 = int_to_ptr.vmem [resolvable:$true] %s175_s28 }
   0xe   : > { %s968_s30 = smov [#allocation7]   ;;  %s809_s9 = scalar_lea.hbm %s1246_s1, 512 }
   0xf   : > { %p723_p9 = pneg %p1046_p8  ;;  %s191_s6 = sshll.u32 %s968_s30, 4  ;;  %s1061_s6 = int_to_ptr.vmem [resolvable:$true] %s191_s6 }
  0x10   : > { %p810_p12 = scmp.ne.s32.totalorder %s1246_s1, %s809_s9  ;;  %p816_p5 = scmp.lt.u32.totalorder %s809_s9, %s1246_s1 }
  0x11   : > { %p1057_p11 = pnand %p723_p9, %p1251_p1 }
  0x13   : > { %p811_p13 = pneg %p1057_p11 }
  0x15   : > { %p812_p0 = pnand %p811_p13, %p810_p12 }
  0x17   : > { %p813_p3 = pneg %p812_p0 }
  0x19   : > { %p818_p7 = pnand %p816_p5, %p813_p3 }
  0x1b   : > { %821 = shalt.err (!%p818_p7)
}
  0x1c   : > { %s822_s14 = scalar_lea.vmem %s1050_s28, 512  ;;  %p830_p2 = scmp.lt.s32.totalorder %s1050_s28, %s1050_s28 }
  0x1d   : > { %p823_p9 = scmp.ne.s32.totalorder %s1050_s28, %s822_s14  ;;  %p831_p12 = scmp.lt.s32.totalorder %s822_s14, %s822_s14 }
  0x1f   : > { %p825_p10 = pnand %p823_p9, %p811_p13  ;;  %p832_p0 = por %p831_p12, %p830_p2 }
  0x21   : > { %p826_p1 = pneg %p825_p10 }
  0x23   : > { %p833_p6 = pnand %p832_p0, %p826_p1 }
  0x25   : > { %836 = shalt.err (!%p833_p6)
}
  0x26   : > { %s969_s15 = smov 128   ;;  %s970_s16 = smov 8  }
  0x27   : > { %726 = dma.hbm_to_vmem [thread:$0]  (!%p1057_p11), %s1246_s1, 512, %s1050_s28, [#allocation6], %s969_s15, %s969_s15, %s970_s16  }
  0x28   : > { %s837_s7 = scalar_lea.hbm %s1248_s3, 2048 }
  0x29   : > { %p838_p2 = scmp.ne.s32.totalorder %s1248_s3, %s837_s7  ;;  %p844_p10 = scmp.lt.u32.totalorder %s837_s7, %s1248_s3 }
  0x2b   : > { %p840_p1 = pnand %p838_p2, %p811_p13 }
  0x2d   : > { %p841_p6 = pneg %p840_p1 }
  0x2f   : > { %p846_p3 = pnand %p844_p10, %p841_p6 }
  0x31   : > { %849 = shalt.err (!%p846_p3)
}
  0x32   : > { %s850_s28 = scalar_lea.vmem %s1061_s6, 2048  ;;  %p858_p12 = scmp.lt.s32.totalorder %s1061_s6, %s1061_s6 }
  0x33   : > { %p851_p5 = scmp.ne.s32.totalorder %s1061_s6, %s850_s28  ;;  %p859_p0 = scmp.lt.s32.totalorder %s850_s28, %s850_s28 }
  0x35   : > { %p853_p7 = pnand %p851_p5, %p811_p13  ;;  %p860_p2 = por %p859_p0, %p858_p12 }
  0x37   : > { %p854_p9 = pneg %p853_p7 }
  0x39   : > { %p861_p1 = pnand %p860_p2, %p854_p9 }
  0x3b   : > { %864 = shalt.err (!%p861_p1)
}
  0x3c   : > { %s971_s12 = smov 64   ;;  %s972_s13 = smov 4  }
  0x3d   : > { %729 = dma.hbm_to_vmem [thread:$0]  (!%p1057_p11), %s1248_s3, 2048, %s1061_s6, [#allocation6], %s971_s12, %s971_s12, %s972_s13  }
  0x3e   : > { %s1116_s16 = sadd.s32 1, %s965_s21   ;;  %s29_s23 = sadd.s32 1, %s961_s20 }
  0x3f   : > { %s26_s17 = ssub.s32 %s965_s21, %s1116_s16  ;;  %p36_p6 = scmp.ne.s32.totalorder %s961_s20, %s957_s19 }
  0x40   : > { %p27_p13 = scmp.eq.s32.totalorder %s26_s17, 0  ;;  %p37_p10 = scmp.eq.s32.totalorder %s965_s21, 0 }
  0x41   : > { %p1258_p5 = scmp.eq.s32.totalorder %s1027_s22, 1  ;;  %p740_p9 = scmp.lt.s32.totalorder %s965_s21, 2 }
  0x42   : > { %s1125_s27 = scalar_select %p27_p13, %s961_s20, %s29_s23  }
  0x43   : > { %p38_p3 = por %p37_p10, %p36_p6  ;;  %p1129_p7 = por %p1258_p5, %p36_p6 }
  0x44   : > { %s208_s29 = sand.u32 1, %s961_s20   ;;  %s657_s6 = sshll.u32 %s965_s21, 6 }
  0x45   : > { %s1259_s30 = scalar_select %p1129_p7, 1, 0 }
  0x46   : > { %s656_s7 = sshll.u32 %s208_s29, 2  ;;  %s1139_s10 = scalar_lea.hbm %s1245_s0, %s657_s6 }
  0x47   : > { %s212_s11 = scalar_lea.vmem [#allocation2], %s656_s7  ;;  %p1143_p11 = pnand %p740_p9, %p38_p3 }
  0x48   : > { %s219_s28 = sshll.u32 %s212_s11, 4  ;;  %s209_s13 = scalar_lea.sflag [#allocation3], %s208_s29  ;;  %s1141_s28 = int_to_ptr.vmem [resolvable:$true] %s219_s28 }
  0x49   : > { %s865_s14 = scalar_lea.hbm %s1139_s10, 64  ;;  %p867_p0 = pneg %p1143_p11 }
  0x4a   : > { %p866_p12 = scmp.ne.s32.totalorder %s1139_s10, %s865_s14  ;;  %s870_s23 = scalar_lea.hbm %s1245_s0, 128 }
  0x4b   : > { %p871_p13 = scmp.lt.u32.totalorder %s1139_s10, %s1245_s0  ;;  %p872_p6 = scmp.lt.u32.totalorder %s870_s23, %s865_s14 }
  0x4c   : > { %p868_p2 = pnand %p867_p0, %p866_p12  ;;  %p874_p3 = scmp.lt.u32.totalorder %s865_s14, %s1139_s10 }
  0x4d   : > { %p873_p10 = por %p872_p6, %p871_p13 }
  0x4e   : > { %p869_p1 = pneg %p868_p2 }
  0x4f   : > { %p875_p5 = por %p874_p3, %p873_p10 }
  0x51   : > { %p876_p9 = pnand %p875_p5, %p869_p1 }
  0x53   : > { %879 = shalt.err (!%p876_p9)
}
  0x54   : > { %s880_s29 = scalar_lea.vmem %s1141_s28, 64  ;;  %s973_s8 = smov [#allocation2]  }
  0x55   : > { %p881_p12 = scmp.ne.s32.totalorder %s1141_s28, %s880_s29  ;;  %s885_s9 = sshll.u32 %s973_s8, 4  ;;  %s886_s9 = int_to_ptr.vmem [resolvable:$false] %s885_s9 }
  0x56   : > { %s887_s11 = scalar_lea.vmem %s886_s9, 128  ;;  %p888_p4 = scmp.lt.s32.totalorder %s1141_s28, %s886_s9 }
  0x57   : > { %p883_p2 = pnand %p881_p12, %p867_p0  ;;  %p889_p13 = scmp.lt.s32.totalorder %s887_s11, %s880_s29 }
  0x59   : > { %p884_p7 = pneg %p883_p2  ;;  %p890_p6 = por %p889_p13, %p888_p4 }
  0x5b   : > { %p891_p10 = pnand %p890_p6, %p884_p7 }
  0x5d   : > { %894 = shalt.err (!%p891_p10)
}
  0x5e   : > { %733 = dma.hbm_to_vmem [thread:$0]  (!%p1143_p11), %s1139_s10, 64, %s1141_s28, %s209_s13  }
  0x5f   : > { %228 = sbr.rel (%p1046_p8) target bundleno = 882 (0x372), region = 40  ;;  %s1175_s14 = sand.u32 (!%p1046_p8), 1, %s957_s19  }
  0x60   : > { %s659_s15 = sshll.u32 (!%p1046_p8), %s1175_s14, 2  ;;  %s231_s17 = scalar_lea.sflag (!%p1046_p8), [#allocation3], %s1175_s14 }
  0x61   : > { %s234_s23 = scalar_lea.vmem (!%p1046_p8), [#allocation2], %s659_s15  ;;  %p1261_p4 = scmp.ne.s32.totalorder (!%p1046_p8), %s1254_s24, 0 }
  0x66   : > { %940 = dma.done.wait (%p1261_p4), %s231_s17, 64  }
  0x67   : > { %942 = vsyncadd (%p1261_p4), %s231_s17, 4294967232  ;;  %p1262_p7 = scmp.eq.s32.totalorder %s1027_s22, 0 }
  0x69   : > { %944 = dma.done.wait (%p1262_p7), [#allocation6], 2560   ;;  %p1263_p8 = pmov %p1262_p7 }
  0x6a   : > { %v974_v0 = vmov 0   ;;  %v783_v1 = vld [vmem:[#allocation5 + $0x4] ss:$8 sps:$4 sm:$0xff]   ;;  %v785_v2 = vld [vmem:[#allocation5] ss:$8 sps:$4 sm:$0xff]   ;;  %vm307_vm0 = vcmask 261120   ;;  %v277_v22 = vlaneseq }
  0x6b   : > { %946 = vsyncadd (%p1263_p8), [#allocation6], 4294964736  ;;  %343 = vmatprep.mubr.bf16.mxu0 %v974_v0  ;;  %311 = vmatprep.subr.bf16.mxu0 %v783_v1  ;;  %v786_v3 = vld [vmem:[#allocation5 + $0x14] ss:$8 sps:$4 sm:$0xff]   ;;  %v788_v4 = vld [vmem:[#allocation5 + $0x10] ss:$8 sps:$4 sm:$0xff]  }
  0x6c   : > { %312 = vmatpush1.bf16.msra.mxu0 %v785_v2  ;;  %v789_v5 = vld [vmem:[#allocation7 + $0x40] sm:$0xff]   ;;  %v270_v7 = vld [vmem:[%s234_s23] sm:$0xf]  ;;  %v791_v8 = vld [vmem:[#allocation7 + $0x48] sm:$0xff]   ;;  %v278_v23 = vshrl.u32 %v277_v22, 7  ;;  %v532_v39 = vand.u32 127, %v277_v22 }
  0x6d   : > { %313 = vmatprep.subr.bf16.mxu0 %v786_v3  ;;  %v790_v6 = vld [vmem:[#allocation7] sm:$0xff]   ;;  %689 = vmatprep.subr.bf16.mxu1 %v789_v5  ;;  %v792_v9 = vld [vmem:[#allocation7 + $0x8] sm:$0xff]   ;;  %v793_v10 = vld [vmem:[#allocation7 + $0x50] sm:$0xff]   ;;  %s686_s12 = sshll.u32 %s1027_s22, 6  ;;  %s268_s13 = scalar_lea.vmem [#allocation8], %s659_s15 }
  0x6e   : > { %690 = vmatpush3.bf16.msra.mxu1 %v790_v6  ;;  %v794_v11 = vld [vmem:[#allocation7 + $0x10] sm:$0xff]   ;;  %v795_v12 = vld [vmem:[#allocation7 + $0x58] sm:$0xff]   ;;  %v797_v14 = vld [vmem:[#allocation7 + $0x60] sm:$0xff]   ;;  %v279_v24 = vsub.s32 0, %v278_v23  ;;  %v283_v26 = vsub.s32 1, %v278_v23  ;;  %vm533_vm1 = vcmp.lt.s32.totalorder %v532_v39, 8  ;;  %s1201_s8 = scalar_lea.hbm %s1250_s5, %s686_s12 }
  0x6f   : > { %691 = vmatprep.subr.bf16.mxu1 %v791_v8  ;;  %v796_v13 = vld [vmem:[#allocation7 + $0x18] sm:$0xff]   ;;  %v798_v15 = vld [vmem:[#allocation7 + $0x20] sm:$0xff]   ;;  %v799_v16 = vld [vmem:[#allocation7 + $0x68] sm:$0xff]   ;;  %vm544_vm2 = vcmp.eq.s32.totalorder %v532_v39, 8  ;;  %s562_s7 = sshll.u32 %s268_s13, 4  ;;  %s549_s9 = scalar_lea.sflag [#allocation4], %s1175_s14  ;;  %s1203_s7 = int_to_ptr.vmem [resolvable:$true] %s562_s7 }
  0x70   : > { %314 = vmatpush1.bf16.msra.mxu0 %v788_v4  ;;  %v800_v17 = vld [vmem:[#allocation7 + $0x28] sm:$0xff]   ;;  %v801_v18 = vld [vmem:[#allocation7 + $0x70] sm:$0xff]   ;;  %v803_v20 = vld [vmem:[#allocation7 + $0x78] sm:$0xff]   ;;  %s895_s11 = scalar_lea.vmem %s1203_s7, 64  ;;  %p1264_p0 = scmp.ne.s32.totalorder %s1259_s30, 0 }
  0x71   : > { %v802_v19 = vld [vmem:[#allocation7 + $0x30] sm:$0xff]   ;;  %v804_v21 = vld [vmem:[#allocation7 + $0x38] sm:$0xff]   ;;  %p896_p11 = scmp.ne.s32.totalorder %s1203_s7, %s895_s11  ;;  %s975_s22 = smov [#allocation8]  }
  0x72   : > { %692 = vmatpush3.bf16.msra.mxu1 %v792_v9  ;;  %v275_v25 = vld [vmem:[%s1247_s2] sm:$0x3]  ;;  %s899_s15 = sshll.u32 %s975_s22, 4  ;;  %s900_s15 = int_to_ptr.vmem [resolvable:$false] %s899_s15 }
  0x73   : > { %667 = vmatmul.mubr.msk.bf16.vlgmr.msra.gmra.mrb[0].mxu0 %vm307_vm0, %v270_v7  ;;  %693 = vmatprep.subr.bf16.mxu1 %v793_v10  ;;  %v280_v27 = vrot.slane %v275_v25, %v279_v24  ;;  %v284_v28 = vrot.slane %v275_v25, %v283_v26  ;;  %v668_v42 = vld [vmem:[%s1249_s4] ss:$0 sm:$0xff]  ;;  %p897_p1 = pnand %p896_p11, %p1264_p0  ;;  %s901_s17 = scalar_lea.vmem %s900_s15, 128 }
  0x74   : > { %p902_p5 = scmp.lt.s32.totalorder %s1203_s7, %s900_s15  ;;  %p903_p9 = scmp.lt.s32.totalorder %s901_s17, %s895_s11 }
  0x75   : > { %p898_p3 = pneg %p897_p1 }
  0x76   : > { %694 = vmatpush3.bf16.msra.mxu1 %v794_v11  ;;  %p904_p12 = por %p903_p9, %p902_p5 }
  0x77   : > { %695 = vmatprep.subr.bf16.mxu1 %v795_v12 }
  0x78   : > { %p905_p2 = pnand %p904_p12, %p898_p3 }
  0x7a   : > { %696 = vmatpush3.bf16.msra.mxu1 %v796_v13 }
  0x7b   : > { %697 = vmatprep.subr.bf16.mxu1 %v797_v14 }
  0x7e   : > { %698 = vmatpush3.bf16.msra.mxu1 %v798_v15 }
  0x7f   : > { %699 = vmatprep.subr.bf16.mxu1 %v799_v16 }
  0x82   : > { %700 = vmatpush3.bf16.msra.mxu1 %v800_v17 }
  0x83   : > { %701 = vmatprep.subr.bf16.mxu1 %v801_v18 }
  0x86   : > { %702 = vmatpush3.bf16.msra.mxu1 %v802_v19 }
  0x87   : > { %703 = vmatprep.subr.bf16.mxu1 %v803_v20 }
  0x8a   : > { %704 = vmatpush3.bf16.msra.mxu1 %v804_v21 }
 0x146   : > { %v345_v29 = vpop.f32.mrb[0].mxu0 }
 0x147   : > { %v346_v30 = vadd.f32 %v345_v29, %v280_v27  ;;  %v347_v31 = vpop.f32.mrb[1].mxu0 }
 0x148   : > { %v348_v32 = vadd.f32 %v347_v31, %v284_v28  ;;  %v349_v33 = vpop.f32.mrb[2].mxu0 }
 0x149   : > { %v352_v34 = vmax.f32 %v346_v30, 0.0  ;;  %v350_v35 = vpop.f32.mrb[3].mxu0 }
 0x14a   : > { %v353_v36 = vmax.f32 %v348_v32, 0.0 }
 0x14b   : > { %v354_v38 = vpack.c.bf16 %v352_v34, %v352_v34 }
 0x14c   : > { %v355_v37 = vpack.c.bf16 %v353_v36, %v353_v36 }
 0x14e   : > { %523 = vmatprep.mubr.bf16.mxu1 %v355_v37 }
 0x14f   : > { %524 = vmatmul.mubr.bf16.vlgmr.msra.gmra.mrb[0].mxu1 %v354_v38 }
 0x222   : > { %v705_v40 = vpop.f32.mrb[0].mxu1 }
 0x223   : > { %v706_v41 = vpop.f32.mrb[1].mxu1 }
 0x224   : > { %v707_v43 = vadd.f32 %v706_v41, %v705_v40  ;;  %v708_v44 = vpop.f32.mrb[2].mxu1 }
 0x225   : > { %v709_v45 = vpop.f32.mrb[3].mxu1 }
 0x226   : > { %v526_v46 = vadd.f32 %v707_v43, %v668_v42 }
 0x228   : > { %v534_v47 = vsel %vm533_vm1, %v526_v46, -inf }
 0x229   : > { %535 = vmax.xlane.f32.xlu0 %v534_v47 }
 0x2b6   : > { %v536_v48 = vpop.xlane.xlu0 %535 }
 0x2b7   : > { %v537_v49 = vsub.f32 %v534_v47, %v536_v48 }
 0x2b9   : > { %v538_v50 = vmul.f32 1.442695, %v537_v49 }
 0x2bb   : > { %805 = vpow2.f32 %v538_v50 }
 0x2c5   : > { %v806_v51 = vpop.eup %805 }
 0x2c6   : > { %540 = vadd.xlane.f32.xlu0 %v806_v51 }
 0x353   : > { %v541_v52 = vpop.xlane.xlu0 %540 }
 0x354   : > { %807 = vrcp.f32 %v541_v52 }
 0x35e   : > { %v808_v53 = vpop.eup %807 }
 0x35f   : > { %v543_v54 = vmul.f32 %v808_v53, %v806_v51 }
 0x361   : > { %v545_v55 = vsel %vm544_vm2, %v526_v46, %v543_v54 }
 0x362   : > { %v546_v56 = vpack.c.bf16 %v545_v55, %v545_v55 }
 0x364   : > { %547 = vst [vmem:[%s268_s13] sm:$0xf] %v546_v56 }
 0x365   : > { %908 = shalt.err (!%p905_p2)
}
 0x366   : > { %s909_s14 = scalar_lea.hbm %s1201_s8, 64  ;;  %s913_s26 = scalar_lea.hbm %s1250_s5, 128 }
 0x367   : > { %p910_p13 = scmp.ne.s32.totalorder %s1201_s8, %s909_s14  ;;  %p914_p4 = scmp.lt.u32.totalorder %s1201_s8, %s1250_s5 }
 0x368   : > { %p915_p7 = scmp.lt.u32.totalorder %s913_s26, %s909_s14  ;;  %p917_p11 = scmp.lt.u32.totalorder %s909_s14, %s1201_s8 }
 0x369   : > { %p911_p6 = pnand %p910_p13, %p1264_p0 }
 0x36a   : > { %p916_p8 = por %p915_p7, %p914_p4 }
 0x36b   : > { %p912_p10 = pneg %p911_p6 }
 0x36c   : > { %p918_p1 = por %p917_p11, %p916_p8 }
 0x36e   : > { %p919_p3 = pnand %p918_p1, %p912_p10 }
 0x370   : > { %922 = shalt.err (!%p919_p3)
}
 0x371   : > { %721 = dma.vmem_to_hbm [thread:$0]  (%p1264_p0), %s1203_s7, 64, %s1201_s8, %s549_s9  }
 0x372 PF: > { %s574_s12 = sand.u32 1, %s953_s18   ;;  %p1265_p5 = scmp.ne.s32.totalorder %s1255_s25, 0 }
 0x373   : > { %p1266_p9 = scmp.ge.s32.totalorder %s965_s21, 2  ;;  %s575_s13 = scalar_lea.sflag [#allocation4], %s574_s12 }
 0x375   : > { %p735_p12 = pnand %p1266_p9, %p1265_p5 }
 0x377   : > { %948 = dma.done.wait (!%p735_p12), %s575_s13, 64  }
 0x378   : > { %950 = vsyncadd (!%p735_p12), %s575_s13, 4294967232  ;;  %p19_p2 = scmp.ge.s32.totalorder %s1116_s16, 4   ;;  %s1267_s18 = smov %s957_s19 }
 0x379   : > { %s1268_s19 = smov %s961_s20  ;;  %s1269_s20 = smov %s1125_s27 }
 0x37a   : > { %s1270_s21 = smov %s1116_s16  ;;  %21 = sbr.rel (!%p19_p2) target bundleno = 6 (0x6), region = 93 }
 0x381   :  { %580 = vsyncpa [#allocation3], 1 }
 0x382   :  { %582 = vsyncpa [#allocation3 + $0x1], 1 }
 0x383   :  { %583 = vsyncpa [#allocation6], 1 }
 0x384   :  { %584 = vsyncpa [#allocation4], 1 }
 0x385   :  { %586 = vsyncpa [#allocation4 + $0x1], 1 }

</bundles_post_ra>
